<compile_context>
chip_gen: v5e
topology: v5e:2x2
jax: 0.10.0
libtpu: 0.0.40
codegen_flags: <defaults>
</compile_context>

<pallas_src>
import jax
import jax.numpy as jnp
from jax import lax
from jax.experimental import pallas as pl
from jax.experimental.pallas import tpu as pltpu

# ----------------------------- synthetic "args" ------------------------------
B = 4            # batch
T = 8            # sequence length
D_TS = 8         # timeseries feature dim (RNN input size)
H_RNN = 32       # args.rnn_hidden_dim (unidirectional, no pooling)
D_IN = 16        # args.input_dim  (static feature dim)
H_FC = 32        # args.hidden_dim
N_CLS = 5        # args.num_classes
NUM_LAYERS = 2   # args.num_layers
EPS = 1e-5       # nn.BatchNorm1d default eps
F_FINAL = H_RNN + H_FC

# Packed weight-slab layout (bf16). Blocks start on 16-row boundaries so bf16 (16,128)
# tiles are never split by a block boundary.
W_COLS = 32
WIH_R0, WHH_R0, W0_R0, W1_R0, WFR_R0, WFF_R0 = 0, 16, 48, 64, 96, 128
W_ROWS = 160
# Packed bias slab (f32): row 0 = b_ih+b_hh, 1 = b0(folded), 2 = b1(folded), 3 = b_final(folded)
B_ROWS, B_COLS = 8, 32


# ------------------------- single fused forward kernel -----------------------
def fused_kernel(xts_ref, x_ref, w_ref, b_ref, hidden_ref, logit_ref):
    w = w_ref[...]                                   # (160, 32) bf16 packed weights
    b = b_ref[...]                                   # (8, 32) f32 packed biases

    wih = w[WIH_R0:WIH_R0 + D_TS, :]                 # (D_TS, H_RNN)
    whh = w[WHH_R0:WHH_R0 + H_RNN, :]                # (H_RNN, H_RNN)
    w0  = w[W0_R0:W0_R0 + D_IN, :]                   # (D_IN, H_FC)
    w1  = w[W1_R0:W1_R0 + H_FC, :]                   # (H_FC, H_FC)
    wfr = w[WFR_R0:WFR_R0 + H_RNN, :]                # (H_RNN, 32)  cols >= N_CLS are zero
    wff = w[WFF_R0:WFF_R0 + H_FC, :]                 # (H_FC, 32)   cols >= N_CLS are zero
    b_rnn = b[0:1, :]
    b0    = b[1:2, :]
    b1    = b[2:3, :]
    bfin  = b[3:4, :]

    # -------- RNN: pre-project ALL timesteps with one MXU push (off the serial chain) ----
    xts = xts_ref[...]                               # (T*B, D_TS) f32, time-major
    xproj = jnp.dot(xts.astype(jnp.bfloat16), wih,
                    preferred_element_type=jnp.float32) + b_rnn     # (T*B, H_RNN)

    h = jnp.zeros((B, H_RNN), jnp.float32)
    for t in range(T):                               # T static -> fully unrolled, h in vregs
        h = jnp.tanh(xproj[t * B:(t + 1) * B, :]
                     + jnp.dot(h.astype(jnp.bfloat16), whh,
                               preferred_element_type=jnp.float32))

    # ------------- fc_encoder: [BN(eval, folded) -> Linear -> ReLU] x 2 -------------------
    f = x_ref[...]                                   # (B, D_IN)
    f = jnp.maximum(jnp.dot(f.astype(jnp.bfloat16), w0,
                            preferred_element_type=jnp.float32) + b0, 0.0)
    f = jnp.maximum(jnp.dot(f.astype(jnp.bfloat16), w1,
                            preferred_element_type=jnp.float32) + b1, 0.0)

    # -------- hidden = concat(h, f): two sub-slice stores (no cross-lane concat) ----------
    hidden_ref[:, 0:H_RNN] = h
    hidden_ref[:, H_RNN:F_FINAL] = f

    # -------- bn_final(folded) -> dropout(identity) -> fc_final (split into two blocks) ---
    logit_full = (jnp.dot(h.astype(jnp.bfloat16), wfr, preferred_element_type=jnp.float32)
                  + jnp.dot(f.astype(jnp.bfloat16), wff, preferred_element_type=jnp.float32)
                  + bfin)                            # (B, 32), cols >= N_CLS are exactly 0
    logit_ref[...] = logit_full[:, 0:N_CLS]


@jax.jit
def abstract_rnn_forward(x, x_timeseries, fp):
    """x: (B, D_IN) static features; x_timeseries: (B, T, D_TS) batch_first."""
    # One-time wrapper-side layout change: time-major, flattened to (T*B, D_TS) so the
    # in-kernel pre-projection is a single clean dot and each per-step slice is a
    # contiguous row block.
    xts_tm = jnp.transpose(x_timeseries, (1, 0, 2)).reshape(T * B, D_TS)
    vmem = pl.BlockSpec(memory_space=pltpu.MemorySpace.VMEM)
    hidden, logit = pl.pallas_call(
        fused_kernel,
        out_shape=(
            jax.ShapeDtypeStruct((B, F_FINAL), jnp.float32),   # 'hidden'
            jax.ShapeDtypeStruct((B, N_CLS), jnp.float32),     # 'logit'
        ),
        in_specs=[vmem, vmem, vmem, vmem],
        out_specs=(vmem, vmem),
    )(xts_tm, x, fp["w_slab"], fp["b_slab"])
    return {"hidden": hidden, "logit": logit}


# ------------------------------ parameters -----------------------------------
def make_params(key):
    ks = list(jax.random.split(key, 20))
    def nrm(k, shape, scale):
        return (scale * jax.random.normal(k, shape)).astype(jnp.float32)
    p = {}
    # RNN weights (stored pre-transposed: x @ W_ih^T  ->  x @ wih_t)
    p["wih_t"] = nrm(ks[0], (D_TS, H_RNN), 1.0 / jnp.sqrt(H_RNN))
    p["whh_t"] = nrm(ks[1], (H_RNN, H_RNN), 1.0 / jnp.sqrt(H_RNN))
    p["bih"] = nrm(ks[2], (1, H_RNN), 0.1)
    p["bhh"] = nrm(ks[3], (1, H_RNN), 0.1)
    # fc_encoder layer 0: BN(D_IN) -> Linear(D_IN, H_FC)
    p["bn0_g"] = 1.0 + nrm(ks[4], (1, D_IN), 0.1)
    p["bn0_b"] = nrm(ks[5], (1, D_IN), 0.1)
    p["bn0_m"] = nrm(ks[6], (1, D_IN), 0.1)
    p["bn0_v"] = 1.0 + 0.1 * jnp.abs(nrm(ks[7], (1, D_IN), 1.0))
    p["w0"] = nrm(ks[8], (D_IN, H_FC), 1.0 / jnp.sqrt(D_IN))
    p["b0"] = nrm(ks[9], (1, H_FC), 0.1)
    # fc_encoder layer 1: BN(H_FC) -> Linear(H_FC, H_FC)
    p["bn1_g"] = 1.0 + nrm(ks[10], (1, H_FC), 0.1)
    p["bn1_b"] = nrm(ks[11], (1, H_FC), 0.1)
    p["bn1_m"] = nrm(ks[12], (1, H_FC), 0.1)
    p["bn1_v"] = 1.0 + 0.1 * jnp.abs(nrm(ks[13], (1, H_FC), 1.0))
    p["w1"] = nrm(ks[14], (H_FC, H_FC), 1.0 / jnp.sqrt(H_FC))
    p["b1"] = nrm(ks[15], (1, H_FC), 0.1)
    # bn_final(F_FINAL) + fc_final(F_FINAL, N_CLS)
    p["bnf_g"] = 1.0 + nrm(ks[16], (1, F_FINAL), 0.1)
    p["bnf_b"] = nrm(ks[17], (1, F_FINAL), 0.1)
    p["bnf_m"] = nrm(ks[18], (1, F_FINAL), 0.1)
    p["bnf_v"] = jnp.ones((1, F_FINAL), jnp.float32)
    kf1, kf2 = jax.random.split(ks[19])
    p["wf"] = nrm(kf1, (F_FINAL, N_CLS), 1.0 / jnp.sqrt(F_FINAL))
    p["bf"] = nrm(kf2, (1, N_CLS), 0.1)
    return p


def fold_params(p):
    """One-time transform: fold eval-mode BN into Linears, split fc_final, pack two slabs."""
    def fold_bn_linear(g, beta, m, v, w, b):
        scale = g * lax.rsqrt(v + EPS)                    # (1, F_in)
        w_f = scale.reshape(-1, 1) * w                    # (F_in, F_out)
        b_f = (beta - m * scale) @ w + b                  # (1, F_out)
        return w_f, b_f

    w0f, b0f = fold_bn_linear(p["bn0_g"], p["bn0_b"], p["bn0_m"], p["bn0_v"], p["w0"], p["b0"])
    w1f, b1f = fold_bn_linear(p["bn1_g"], p["bn1_b"], p["bn1_m"], p["bn1_v"], p["w1"], p["b1"])
    wff, bff = fold_bn_linear(p["bnf_g"], p["bnf_b"], p["bnf_m"], p["bnf_v"], p["wf"], p["bf"])

    slab = jnp.zeros((W_ROWS, W_COLS), jnp.float32)
    def put(s, r0, wm):
        r, c = wm.shape
        return s.at[r0:r0 + r, 0:c].set(wm)
    slab = put(slab, WIH_R0, p["wih_t"])
    slab = put(slab, WHH_R0, p["whh_t"])
    slab = put(slab, W0_R0, w0f)
    slab = put(slab, W1_R0, w1f)
    slab = put(slab, WFR_R0, wff[:H_RNN])                 # fc_final rows hit by rnn part
    slab = put(slab, WFF_R0, wff[H_RNN:])                 # fc_final rows hit by fc part

    bias = jnp.zeros((B_ROWS, B_COLS), jnp.float32)
    bias = bias.at[0, :H_RNN].set((p["bih"] + p["bhh"]).reshape(-1))
    bias = bias.at[1, :H_FC].set(b0f.reshape(-1))
    bias = bias.at[2, :H_FC].set(b1f.reshape(-1))
    bias = bias.at[3, :N_CLS].set(bff.reshape(-1))

    return {"w_slab": slab.astype(jnp.bfloat16), "b_slab": bias}


# ------------------------------- reference -----------------------------------
def reference_forward(x, x_timeseries, p):
    h = jnp.zeros((B, H_RNN), jnp.float32)
    for t in range(T):
        h = jnp.tanh(x_timeseries[:, t] @ p["wih_t"] + p["bih"]
                     + h @ p["whh_t"] + p["bhh"])
    f = x
    for l in range(NUM_LAYERS):
        g, b_, m, v = (p[f"bn{l}_g"], p[f"bn{l}_b"], p[f"bn{l}_m"], p[f"bn{l}_v"])
        f = (f - m) * lax.rsqrt(v + EPS) * g + b_
        f = jnp.maximum(f @ p[f"w{l}"] + p[f"b{l}"], 0.0)
    hidden = jnp.concatenate([h, f], axis=-1)
    hn = (hidden - p["bnf_m"]) * lax.rsqrt(p["bnf_v"] + EPS) * p["bnf_g"] + p["bnf_b"]
    logit = hn @ p["wf"] + p["bf"]
    return {"hidden": hidden, "logit": logit}


if __name__ == "__main__":
    key = jax.random.PRNGKey(0)
    k_x, k_ts, k_p = jax.random.split(key, 3)
    x = jax.random.normal(k_x, (B, D_IN), dtype=jnp.float32)
    x_timeseries = jax.random.normal(k_ts, (B, T, D_TS), dtype=jnp.float32)
    params = make_params(k_p)
    folded = fold_params(params)

    out = abstract_rnn_forward(x, x_timeseries, folded)
    jax.block_until_ready(out)

    ref = reference_forward(x, x_timeseries, params)
    # bf16 weights/activation-casts at the matmuls -> compare against the f32 reference
    # with bf16-class tolerance.
    assert jnp.allclose(out["hidden"], ref["hidden"], atol=5e-2, rtol=5e-2)
    assert jnp.allclose(out["logit"], ref["logit"], atol=5e-2, rtol=5e-2)
    print("KERNEL_OK")
</pallas_src>

<mosaic_0001>
module attributes {stable_mosaic.version = 11 : i64} {
  func.func @fused_kernel(%arg0: memref<32x8xf32, #tpu.memory_space<vmem>>, %arg1: memref<4x16xf32, #tpu.memory_space<vmem>>, %arg2: memref<160x32xbf16, #tpu.memory_space<vmem>>, %arg3: memref<8x32xf32, #tpu.memory_space<vmem>>, %arg4: memref<4x64xf32, #tpu.memory_space<vmem>>, %arg5: memref<4x5xf32, #tpu.memory_space<vmem>>) attributes {dimension_semantics = [], scalar_prefetch = 0 : i64, scratch_operands = 0 : i64, tpu.core_type = #tpu.core_type<tc>} {
    %c0 = arith.constant 0 : index
    %c0_0 = arith.constant 0 : index
    %0 = vector.load %arg2[%c0, %c0_0] : memref<160x32xbf16, #tpu.memory_space<vmem>>, vector<160x32xbf16>
    %c0_1 = arith.constant 0 : index
    %c0_2 = arith.constant 0 : index
    %1 = vector.load %arg3[%c0_1, %c0_2] : memref<8x32xf32, #tpu.memory_space<vmem>>, vector<8x32xf32>
    %2 = vector.extract_strided_slice %0 {offsets = [0, 0], sizes = [8, 32], strides = [1, 1]} : vector<160x32xbf16> to vector<8x32xbf16>
    %3 = vector.extract_strided_slice %0 {offsets = [16, 0], sizes = [32, 32], strides = [1, 1]} : vector<160x32xbf16> to vector<32x32xbf16>
    %4 = vector.extract_strided_slice %0 {offsets = [48, 0], sizes = [16, 32], strides = [1, 1]} : vector<160x32xbf16> to vector<16x32xbf16>
    %5 = vector.extract_strided_slice %0 {offsets = [64, 0], sizes = [32, 32], strides = [1, 1]} : vector<160x32xbf16> to vector<32x32xbf16>
    %6 = vector.extract_strided_slice %0 {offsets = [96, 0], sizes = [32, 32], strides = [1, 1]} : vector<160x32xbf16> to vector<32x32xbf16>
    %7 = vector.extract_strided_slice %0 {offsets = [128, 0], sizes = [32, 32], strides = [1, 1]} : vector<160x32xbf16> to vector<32x32xbf16>
    %8 = vector.extract_strided_slice %1 {offsets = [0, 0], sizes = [1, 32], strides = [1, 1]} : vector<8x32xf32> to vector<1x32xf32>
    %9 = vector.extract_strided_slice %1 {offsets = [1, 0], sizes = [1, 32], strides = [1, 1]} : vector<8x32xf32> to vector<1x32xf32>
    %10 = vector.extract_strided_slice %1 {offsets = [2, 0], sizes = [1, 32], strides = [1, 1]} : vector<8x32xf32> to vector<1x32xf32>
    %11 = vector.extract_strided_slice %1 {offsets = [3, 0], sizes = [1, 32], strides = [1, 1]} : vector<8x32xf32> to vector<1x32xf32>
    %c0_3 = arith.constant 0 : index
    %c0_4 = arith.constant 0 : index
    %12 = vector.load %arg0[%c0_3, %c0_4] : memref<32x8xf32, #tpu.memory_space<vmem>>, vector<32x8xf32>
    %13 = arith.truncf %12 : vector<32x8xf32> to vector<32x8xbf16>
    %cst = arith.constant dense<0.000000e+00> : vector<32x32xf32>
    %14 = tpu.matmul %13, %2, %cst {dimension_numbers = #tpu.dot_dimension_numbers<[1], [0], [0], [1], [0, 0, 1, 1], [], []>} : vector<32x8xbf16>, vector<8x32xbf16>, vector<32x32xf32> -> vector<32x32xf32>
    %15 = vector.broadcast %8 : vector<1x32xf32> to vector<32x32xf32>
    %16 = arith.addf %14, %15 : vector<32x32xf32>
    %cst_5 = arith.constant 0.000000e+00 : f32
    %17 = vector.broadcast %cst_5 : f32 to vector<4x32xf32>
    %18 = vector.extract_strided_slice %16 {offsets = [0, 0], sizes = [4, 32], strides = [1, 1]} : vector<32x32xf32> to vector<4x32xf32>
    %19 = arith.truncf %17 : vector<4x32xf32> to vector<4x32xbf16>
    %cst_6 = arith.constant dense<0.000000e+00> : vector<4x32xf32>
    %20 = tpu.matmul %19, %3, %cst_6 {dimension_numbers = #tpu.dot_dimension_numbers<[1], [0], [0], [1], [0, 0, 1, 1], [], []>} : vector<4x32xbf16>, vector<32x32xbf16>, vector<4x32xf32> -> vector<4x32xf32>
    %21 = arith.addf %18, %20 : vector<4x32xf32>
    %22 = math.tanh %21 : vector<4x32xf32>
    %23 = vector.extract_strided_slice %16 {offsets = [4, 0], sizes = [4, 32], strides = [1, 1]} : vector<32x32xf32> to vector<4x32xf32>
    %24 = arith.truncf %22 : vector<4x32xf32> to vector<4x32xbf16>
    %cst_7 = arith.constant dense<0.000000e+00> : vector<4x32xf32>
    %25 = tpu.matmul %24, %3, %cst_7 {dimension_numbers = #tpu.dot_dimension_numbers<[1], [0], [0], [1], [0, 0, 1, 1], [], []>} : vector<4x32xbf16>, vector<32x32xbf16>, vector<4x32xf32> -> vector<4x32xf32>
    %26 = arith.addf %23, %25 : vector<4x32xf32>
    %27 = math.tanh %26 : vector<4x32xf32>
    %28 = vector.extract_strided_slice %16 {offsets = [8, 0], sizes = [4, 32], strides = [1, 1]} : vector<32x32xf32> to vector<4x32xf32>
    %29 = arith.truncf %27 : vector<4x32xf32> to vector<4x32xbf16>
    %cst_8 = arith.constant dense<0.000000e+00> : vector<4x32xf32>
    %30 = tpu.matmul %29, %3, %cst_8 {dimension_numbers = #tpu.dot_dimension_numbers<[1], [0], [0], [1], [0, 0, 1, 1], [], []>} : vector<4x32xbf16>, vector<32x32xbf16>, vector<4x32xf32> -> vector<4x32xf32>
    %31 = arith.addf %28, %30 : vector<4x32xf32>
    %32 = math.tanh %31 : vector<4x32xf32>
    %33 = vector.extract_strided_slice %16 {offsets = [12, 0], sizes = [4, 32], strides = [1, 1]} : vector<32x32xf32> to vector<4x32xf32>
    %34 = arith.truncf %32 : vector<4x32xf32> to vector<4x32xbf16>
    %cst_9 = arith.constant dense<0.000000e+00> : vector<4x32xf32>
    %35 = tpu.matmul %34, %3, %cst_9 {dimension_numbers = #tpu.dot_dimension_numbers<[1], [0], [0], [1], [0, 0, 1, 1], [], []>} : vector<4x32xbf16>, vector<32x32xbf16>, vector<4x32xf32> -> vector<4x32xf32>
    %36 = arith.addf %33, %35 : vector<4x32xf32>
    %37 = math.tanh %36 : vector<4x32xf32>
    %38 = vector.extract_strided_slice %16 {offsets = [16, 0], sizes = [4, 32], strides = [1, 1]} : vector<32x32xf32> to vector<4x32xf32>
    %39 = arith.truncf %37 : vector<4x32xf32> to vector<4x32xbf16>
    %cst_10 = arith.constant dense<0.000000e+00> : vector<4x32xf32>
    %40 = tpu.matmul %39, %3, %cst_10 {dimension_numbers = #tpu.dot_dimension_numbers<[1], [0], [0], [1], [0, 0, 1, 1], [], []>} : vector<4x32xbf16>, vector<32x32xbf16>, vector<4x32xf32> -> vector<4x32xf32>
    %41 = arith.addf %38, %40 : vector<4x32xf32>
    %42 = math.tanh %41 : vector<4x32xf32>
    %43 = vector.extract_strided_slice %16 {offsets = [20, 0], sizes = [4, 32], strides = [1, 1]} : vector<32x32xf32> to vector<4x32xf32>
    %44 = arith.truncf %42 : vector<4x32xf32> to vector<4x32xbf16>
    %cst_11 = arith.constant dense<0.000000e+00> : vector<4x32xf32>
    %45 = tpu.matmul %44, %3, %cst_11 {dimension_numbers = #tpu.dot_dimension_numbers<[1], [0], [0], [1], [0, 0, 1, 1], [], []>} : vector<4x32xbf16>, vector<32x32xbf16>, vector<4x32xf32> -> vector<4x32xf32>
    %46 = arith.addf %43, %45 : vector<4x32xf32>
    %47 = math.tanh %46 : vector<4x32xf32>
    %48 = vector.extract_strided_slice %16 {offsets = [24, 0], sizes = [4, 32], strides = [1, 1]} : vector<32x32xf32> to vector<4x32xf32>
    %49 = arith.truncf %47 : vector<4x32xf32> to vector<4x32xbf16>
    %cst_12 = arith.constant dense<0.000000e+00> : vector<4x32xf32>
    %50 = tpu.matmul %49, %3, %cst_12 {dimension_numbers = #tpu.dot_dimension_numbers<[1], [0], [0], [1], [0, 0, 1, 1], [], []>} : vector<4x32xbf16>, vector<32x32xbf16>, vector<4x32xf32> -> vector<4x32xf32>
    %51 = arith.addf %48, %50 : vector<4x32xf32>
    %52 = math.tanh %51 : vector<4x32xf32>
    %53 = vector.extract_strided_slice %16 {offsets = [28, 0], sizes = [4, 32], strides = [1, 1]} : vector<32x32xf32> to vector<4x32xf32>
    %54 = arith.truncf %52 : vector<4x32xf32> to vector<4x32xbf16>
    %cst_13 = arith.constant dense<0.000000e+00> : vector<4x32xf32>
    %55 = tpu.matmul %54, %3, %cst_13 {dimension_numbers = #tpu.dot_dimension_numbers<[1], [0], [0], [1], [0, 0, 1, 1], [], []>} : vector<4x32xbf16>, vector<32x32xbf16>, vector<4x32xf32> -> vector<4x32xf32>
    %56 = arith.addf %53, %55 : vector<4x32xf32>
    %57 = math.tanh %56 : vector<4x32xf32>
    %c0_14 = arith.constant 0 : index
    %c0_15 = arith.constant 0 : index
    %58 = vector.load %arg1[%c0_14, %c0_15] : memref<4x16xf32, #tpu.memory_space<vmem>>, vector<4x16xf32>
    %59 = arith.truncf %58 : vector<4x16xf32> to vector<4x16xbf16>
    %cst_16 = arith.constant dense<0.000000e+00> : vector<4x32xf32>
    %60 = tpu.matmul %59, %4, %cst_16 {dimension_numbers = #tpu.dot_dimension_numbers<[1], [0], [0], [1], [0, 0, 1, 1], [], []>} : vector<4x16xbf16>, vector<16x32xbf16>, vector<4x32xf32> -> vector<4x32xf32>
    %61 = vector.broadcast %9 : vector<1x32xf32> to vector<4x32xf32>
    %62 = arith.addf %60, %61 : vector<4x32xf32>
    %cst_17 = arith.constant 0.000000e+00 : f32
    %63 = vector.broadcast %cst_17 : f32 to vector<4x32xf32>
    %64 = arith.maximumf %62, %63 : vector<4x32xf32>
    %65 = arith.truncf %64 : vector<4x32xf32> to vector<4x32xbf16>
    %cst_18 = arith.constant dense<0.000000e+00> : vector<4x32xf32>
    %66 = tpu.matmul %65, %5, %cst_18 {dimension_numbers = #tpu.dot_dimension_numbers<[1], [0], [0], [1], [0, 0, 1, 1], [], []>} : vector<4x32xbf16>, vector<32x32xbf16>, vector<4x32xf32> -> vector<4x32xf32>
    %67 = vector.broadcast %10 : vector<1x32xf32> to vector<4x32xf32>
    %68 = arith.addf %66, %67 : vector<4x32xf32>
    %cst_19 = arith.constant 0.000000e+00 : f32
    %69 = vector.broadcast %cst_19 : f32 to vector<4x32xf32>
    %70 = arith.maximumf %68, %69 : vector<4x32xf32>
    %c0_20 = arith.constant 0 : index
    %c0_21 = arith.constant 0 : index
    %71 = vector.load %arg4[%c0_20, %c0_21] : memref<4x64xf32, #tpu.memory_space<vmem>>, vector<4x32xf32>
    tpu.vector_store %arg4[%c0_20, %c0_21], %57 {strides = array<i32>} : memref<4x64xf32, #tpu.memory_space<vmem>>, vector<4x32xf32>,
    %c0_22 = arith.constant 0 : index
    %c32 = arith.constant 32 : index
    %72 = vector.load %arg4[%c0_22, %c32] : memref<4x64xf32, #tpu.memory_space<vmem>>, vector<4x32xf32>
    tpu.vector_store %arg4[%c0_22, %c32], %70 {strides = array<i32>} : memref<4x64xf32, #tpu.memory_space<vmem>>, vector<4x32xf32>,
    %73 = arith.truncf %57 : vector<4x32xf32> to vector<4x32xbf16>
    %cst_23 = arith.constant dense<0.000000e+00> : vector<4x32xf32>
    %74 = tpu.matmul %73, %6, %cst_23 {dimension_numbers = #tpu.dot_dimension_numbers<[1], [0], [0], [1], [0, 0, 1, 1], [], []>} : vector<4x32xbf16>, vector<32x32xbf16>, vector<4x32xf32> -> vector<4x32xf32>
    %75 = arith.truncf %70 : vector<4x32xf32> to vector<4x32xbf16>
    %cst_24 = arith.constant dense<0.000000e+00> : vector<4x32xf32>
    %76 = tpu.matmul %75, %7, %cst_24 {dimension_numbers = #tpu.dot_dimension_numbers<[1], [0], [0], [1], [0, 0, 1, 1], [], []>} : vector<4x32xbf16>, vector<32x32xbf16>, vector<4x32xf32> -> vector<4x32xf32>
    %77 = arith.addf %74, %76 : vector<4x32xf32>
    %78 = vector.broadcast %11 : vector<1x32xf32> to vector<4x32xf32>
    %79 = arith.addf %77, %78 : vector<4x32xf32>
    %80 = vector.extract_strided_slice %79 {offsets = [0, 0], sizes = [4, 5], strides = [1, 1]} : vector<4x32xf32> to vector<4x5xf32>
    %c0_25 = arith.constant 0 : index
    %c0_26 = arith.constant 0 : index
    %81 = vector.load %arg5[%c0_25, %c0_26] : memref<4x5xf32, #tpu.memory_space<vmem>>, vector<4x5xf32>
    tpu.vector_store %arg5[%c0_25, %c0_26], %80 {strides = array<i32>} : memref<4x5xf32, #tpu.memory_space<vmem>>, vector<4x5xf32>,
    return
  }
}

</mosaic_0001>

<bundles_post_ra>
// kernel: abstract_rnn_forward.1
= control target key start
LH: loop header
LB: loop body
LE: loop exit
PB: predicated region body
PF: predicated region fallthrough
CT: control target
= control target key end

     0   :  { %11 = vsyncpa [#allocation3], 0  ;;  %vm56_vm0 = vcmask 1043456   ;;  %vm49_vm1 = vcmask 64512   ;;  %s665_s0 = inlined_call_operand.vmem [shape: f32[32,8], index: 0, kind: input, shape index: {}]   ;;  %s666_s1 = inlined_call_operand.vmem [shape: f32[4,16], index: 1, kind: input, shape index: {}]   ;;  %s667_s2 = inlined_call_operand.vmem [shape: bf16[160,32], index: 2, kind: input, shape index: {}]   ;;  %s668_s3 = inlined_call_operand.vmem [shape: f32[8,32], index: 3, kind: input, shape index: {}]   ;;  %s669_s4 = inlined_call_operand.hbm [shape: f32[4,64], index: 4, kind: output, shape index: {0}]   ;;  %s670_s5 = inlined_call_operand.hbm [shape: f32[4,5], index: 5, kind: output, shape index: {1}]  }
   0x1   :  { %v22_v0 = vld [vmem:[%s667_s2] sm:$0xf]  ;;  %v473_v1 = vld [vmem:[%s667_s2 + $0x10] sm:$0xff]  ;;  %v43_v4 = vld [vmem:[%s665_s0 + $0x8] sm:$0xff] }
   0x2   :  { %v42_v2 = vld [vmem:[%s665_s0] sm:$0xff]  ;;  %v58_v3 = vsel %vm56_vm0, %v22_v0, 0  ;;  %101 = vmatpush.bf16.msra.mxu1 %v473_v1  ;;  %v472_v6 = vld [vmem:[%s667_s2 + $0x8] sm:$0xff] }
   0x3   :  { %67 = vmatpush.bf16.msra.mxu0 %v58_v3  ;;  %v46_v5 = vpack.c.bf16 %v43_v4, %v42_v2 }
   0x4   :  { %12 = vsyncpa [#allocation5], 0  ;;  %120 = vmatpush.bf16.msra.mxu2 %v473_v1  ;;  %144 = vmatpush.bf16.msra.mxu3 %v473_v1  ;;  %v553_v7 = vmov 0   ;;  %v606_v8 = vld [vmem:[%s668_s3] sm:$0xff]  ;;  %vm91_vm2 = vcmask 261120   ;;  %v44_v31 = vld [vmem:[%s665_s0 + $0x10] sm:$0xff] }
   0x5   :  { %v609_v9 = vperm.slane %v606_v8, 0  ;;  %v45_v32 = vld [vmem:[%s665_s0 + $0x18] sm:$0xff]  ;;  %v261_v49 = vld [vmem:[%s666_s1] sm:$0xf]  ;;  %vm270_vm3 = vcmask 130048   ;;  %v476_v51 = vld [vmem:[%s667_s2 + $0x28] sm:$0xff] }
   0x6   :  { %423 = vmatmul.msk.bf16.vlgmr.msra.gmra.mxu0 %vm49_vm1, %v46_v5  ;;  %102 = vmatpush.bf16.msra.mxu1 %v472_v6  ;;  %v47_v33 = vpack.c.bf16 %v45_v32, %v44_v31  ;;  %v474_v48 = vld [vmem:[%s667_s2 + $0x18] sm:$0xff]  ;;  %v262_v50 = vpack.c.bf16 %v261_v49, %v261_v49  ;;  %v263_v59 = vperm.slane %v606_v8, 1  ;;  %v475_v62 = vld [vmem:[%s667_s2 + $0x20] sm:$0xff]  ;;  %s554_s18 = smov 32   ;;  %vm319_vm4 = vcmask 261124   ;;  %s555_s23 = smov [#allocation2]  }
   0x7   :  { %230 = vmatpush.bf16.msrb.mxu0 %v473_v1  ;;  %s396_s24 = sshll.u32 %s555_s23, 4  ;;  %s398_s27 = sshll.u32 %s669_s4, 4  ;;  %vm325_vm5 = vcmask 519424   ;;  %vm389_vm6 = vcmask 35840   ;;  %s397_s24 = int_to_ptr.vmem [resolvable:$true] %s396_s24  ;;  %s399_s27 = int_to_ptr.hbm [resolvable:$true] %s398_s27 }
   0x8   :  { %121 = vmatpush.bf16.msra.mxu2 %v472_v6  ;;  %145 = vmatpush.bf16.msra.mxu3 %v472_v6  ;;  %s409_s30 = sshll.u32 %s670_s5, 4  ;;  %s410_s30 = int_to_ptr.hbm [resolvable:$true] %s409_s30 }
   0x9   :  { %103 = vmatmul.bf16.vlgmr.msra.gmra.mxu1 %v553_v7 }
   0xa   :  { %163 = vmatpush.bf16.msrb.mxu1 %v473_v1 }
   0xb   :  { %231 = vmatpush.bf16.msrb.mxu0 %v472_v6 }
   0xc   :  { %187 = vmatpush.bf16.msrb.mxu2 %v473_v1  ;;  %206 = vmatpush.bf16.msrb.mxu3 %v473_v1 }
   0xe   :  { %164 = vmatpush.bf16.msrb.mxu1 %v472_v6 }
  0x10   :  { %188 = vmatpush.bf16.msrb.mxu2 %v472_v6  ;;  %207 = vmatpush.bf16.msrb.mxu3 %v472_v6 }
  0x12   :  { %249 = vmatpush.bf16.msra.mxu1 %v473_v1 }
  0x16   :  { %250 = vmatpush.bf16.msra.mxu1 %v472_v6  ;;  %424 = vmatmul.msk.bf16.gmra.mxu0 %vm49_vm1, %v47_v33 }
  0x83   :  { %v69_v10 = vpop.f32.mrf.mxu0 }
  0x84   :  { %v70_v11 = vadd.f32 %v69_v10, %v609_v9 }
  0x86   :  { %v104_v12 = vpop.f32.mrf.mxu1 }
  0x87   :  { %v108_v13 = vadd.f32 %v104_v12, %v70_v11  ;;  %v289_v12 = vperm.slane %v606_v8, 2 }
  0x89   :  { %485 = vtanh.f32 %v108_v13 }
  0x8b   :  { %v71_v24 = vpop.f32.mrf.mxu0 }
  0x8c   :  { %v72_v25 = vadd.f32 %v71_v24, %v609_v9 }
  0x8e   :  { %v106_v14 = vpop.f32.mrf.mxu1 }
  0x8f   :  { %v486_v15 = vpop.eup %485 }
  0x90   :  { %v110_v16 = vpack.c.bf16 %v486_v15, %v486_v15 }
  0x92   :  { %433 = vmatmul.msk.bf16.vlgmr.msra.gmra.mxu2 %vm91_vm2, %v110_v16 }
  0x93   :  { %v74_v41 = vpop.f32.mrf.mxu0  ;;  %281 = vmatpush.bf16.msra.mxu2 %v474_v48 }
  0x94   :  { %v75_v42 = vadd.f32 %v74_v41, %v609_v9 }
  0x9b   :  { %v76_v2 = vpop.f32.mrf.mxu0 }
  0x9c   :  { %v77_v3 = vadd.f32 %v76_v2, %v609_v9  ;;  %v479_v9 = vld [vmem:[%s667_s2 + $0x40] sm:$0xff] }
 0x115   :  { %v123_v17 = vpop.f32.mrf.mxu2 }
 0x116   :  { %v128_v18 = vrot.slane %v123_v17, 4  ;;  %v478_v17 = vld [vmem:[%s667_s2 + $0x38] sm:$0xff] }
 0x118   :  { %v130_v19 = vadd.f32 %v128_v18, %v70_v11  ;;  %v480_v11 = vld [vmem:[%s667_s2 + $0x48] sm:$0xff] }
 0x119   :  { %350 = vmatpush.bf16.msra.mxu0 %v480_v11 }
 0x11a   :  { %487 = vtanh.f32 %v130_v19  ;;  %v477_v19 = vld [vmem:[%s667_s2 + $0x30] sm:$0xff]  ;;  %s556_s2 = smov [#allocation4]  }
 0x11b   :  { %s407_s28 = sshll.u32 %s556_s2, 4  ;;  %s408_s28 = int_to_ptr.vmem [resolvable:$true] %s407_s28 }
 0x11d   :  { %v125_v20 = vpop.f32.mrf.mxu2  ;;  %351 = vmatpush.bf16.msra.mxu0 %v479_v9 }
 0x120   :  { %v488_v21 = vpop.eup %487 }
 0x121   :  { %v132_v22 = vpack.c.bf16 %v488_v21, %v488_v21 }
 0x123   :  { %v134_v23 = vrot.slane %v132_v22, 2 }
 0x125   :  { %434 = vmatmul.msk.bf16.vlgmr.msra.gmra.mxu3 %vm91_vm2, %v134_v23 }
 0x126   :  { %311 = vmatpush.bf16.msra.mxu3 %v476_v51 }
 0x12a   :  { %312 = vmatpush.bf16.msra.mxu3 %v475_v62 }
 0x1a8   :  { %v147_v26 = vpop.f32.mrf.mxu3 }
 0x1a9   :  { %v151_v27 = vadd.f32 %v147_v26, %v72_v25 }
 0x1ab   :  { %489 = vtanh.f32 %v151_v27 }
 0x1b0   :  { %v149_v28 = vpop.f32.mrf.mxu3 }
 0x1b1   :  { %v490_v29 = vpop.eup %489 }
 0x1b2   :  { %v153_v30 = vpack.c.bf16 %v490_v29, %v490_v29 }
 0x1b4   :  { %435 = vmatmul.msk.bf16.vlgmr.msrb.gmra.mxu1 %vm91_vm2, %v153_v30  ;;  %v387_v30 = vperm.slane %v606_v8, 3 }
 0x1b5   :  { %380 = vmatpush.bf16.msrb.mxu1 %v478_v17 }
 0x1b9   :  { %381 = vmatpush.bf16.msrb.mxu1 %v477_v19 }
 0x231   :  { %v166_v34 = vpop.f32.mrf.mxu1 }
 0x232   :  { %v171_v35 = vrot.slane %v166_v34, 4 }
 0x234   :  { %v173_v36 = vadd.f32 %v171_v35, %v72_v25 }
 0x236   :  { %491 = vtanh.f32 %v173_v36 }
 0x239   :  { %v168_v37 = vpop.f32.mrf.mxu1 }
 0x23c   :  { %v492_v38 = vpop.eup %491 }
 0x23d   :  { %v175_v39 = vpack.c.bf16 %v492_v38, %v492_v38 }
 0x23f   :  { %v177_v40 = vrot.slane %v175_v39, 2 }
 0x241   :  { %436 = vmatmul.msk.bf16.vlgmr.msrb.gmra.mxu2 %vm91_vm2, %v177_v40 }
 0x251   :  { %444 = vmatmul.msk.bf16.vlgmr.msra.gmra.mxu2 %vm270_vm3, %v262_v50 }
 0x2c4   :  { %v190_v43 = vpop.f32.mrf.mxu2 }
 0x2c5   :  { %v194_v44 = vadd.f32 %v190_v43, %v75_v42 }
 0x2c7   :  { %493 = vtanh.f32 %v194_v44 }
 0x2cc   :  { %v192_v45 = vpop.f32.mrf.mxu2 }
 0x2cd   :  { %v494_v46 = vpop.eup %493 }
 0x2ce   :  { %v196_v47 = vpack.c.bf16 %v494_v46, %v494_v46 }
 0x2d0   :  { %437 = vmatmul.msk.bf16.vlgmr.msrb.gmra.mxu3 %vm91_vm2, %v196_v47 }
 0x2d4   :  { %v283_v60 = vpop.f32.mrf.mxu2 }
 0x2d5   :  { %v284_v61 = vadd.f32 %v283_v60, %v263_v59 }
 0x2d7   :  { %v287_v63 = vmax.f32 %v284_v61, 0.0 }
 0x2d9   :  { %v288_v0 = vpack.c.bf16 %v287_v63, %v287_v63 }
 0x2dc   :  { %v285_v1 = vpop.f32.mrf.mxu2 }
 0x2e0   :  { %453 = vmatmul.msk.bf16.vlgmr.msra.gmra.mxu3 %vm91_vm2, %v288_v0 }
 0x353   :  { %v209_v52 = vpop.f32.mrf.mxu3 }
 0x354   :  { %v214_v53 = vrot.slane %v209_v52, 4 }
 0x356   :  { %v216_v54 = vadd.f32 %v214_v53, %v75_v42 }
 0x358   :  { %495 = vtanh.f32 %v216_v54 }
 0x35b   :  { %v211_v55 = vpop.f32.mrf.mxu3 }
 0x35e   :  { %v496_v56 = vpop.eup %495 }
 0x35f   :  { %v218_v57 = vpack.c.bf16 %v496_v56, %v496_v56 }
 0x361   :  { %v220_v58 = vrot.slane %v218_v57, 2 }
 0x363   :  { %438 = vmatmul.msk.bf16.vlgmr.msrb.gmra.mxu0 %vm91_vm2, %v220_v58  ;;  %v314_v13 = vpop.f32.mrf.mxu3 }
 0x364   :  { %v315_v14 = vadd.f32 %v314_v13, %v289_v12 }
 0x366   :  { %v318_v15 = vmax.f32 %v315_v14, 0.0 }
 0x368   :  { %v328_v16 = vpack.c.bf16 %v318_v15, %v318_v15  ;;  %322 = vrot.lane.b32.xlu0 %v318_v15, %s554_s18 }
 0x36b   :  { %v316_v18 = vpop.f32.mrf.mxu3 }
 0x373   :  { %462 = vmatmul.msk.bf16.vlgmr.msra.gmra.mxu0 %vm91_vm2, %v328_v16 }
 0x3da   :  { %v323_v27 = vpop.permute.xlu0 %322 }
 0x3e0   :  { %v233_v4 = vpop.f32.mrf.mxu0 }
 0x3e1   :  { %v237_v5 = vadd.f32 %v233_v4, %v77_v3 }
 0x3e3   :  { %497 = vtanh.f32 %v237_v5 }
 0x3e8   :  { %v235_v6 = vpop.f32.mrf.mxu0 }
 0x3e9   :  { %v498_v7 = vpop.eup %497 }
 0x3ea   :  { %v239_v10 = vpack.c.bf16 %v498_v7, %v498_v7 }
 0x3ec   :  { %439 = vmatmul.msk.bf16.vlgmr.msra.gmra.mxu1 %vm91_vm2, %v239_v10 }
 0x3f0   :  { %v353_v28 = vpop.f32.mrf.mxu0 }
 0x3f8   :  { %v355_v29 = vpop.f32.mrf.mxu0 }
 0x469   :  { %v252_v20 = vpop.f32.mrf.mxu1 }
 0x46a   :  { %v257_v21 = vrot.slane %v252_v20, 4 }
 0x46c   :  { %v259_v22 = vadd.f32 %v257_v21, %v77_v3 }
 0x46e   :  { %499 = vtanh.f32 %v259_v22 }
 0x471   :  { %v254_v23 = vpop.f32.mrf.mxu1 }
 0x474   :  { %v500_v24 = vpop.eup %499 }
 0x475   :  { %v327_v25 = vpack.c.bf16 %v500_v24, %v500_v24  ;;  %320 = vst.msk [vmem:[#allocation2 - $0x4] sm:$0xf0] %vm319_vm4, %v500_v24 }
 0x476   :  { %326 = vst.msk [vmem:[#allocation2] sm:$0xf] %vm325_vm5, %v323_v27 }
 0x477   :  { %v358_v26 = vrot.slane %v327_v25, 2  ;;  %401 = dma.vmem_to_hbm [thread:$0]  %s397_s24, 64, %s399_s27, [#allocation3]  }
 0x479   :  { %471 = vmatmul.msk.bf16.vlgmr.msrb.gmra.mxu1 %vm91_vm2, %v358_v26 }
 0x4f6   :  { %v383_v31 = vpop.f32.mrf.mxu1 }
 0x4f7   :  { %v384_v32 = vadd.f32 %v383_v31, %v353_v28 }
 0x4f9   :  { %v388_v33 = vadd.f32 %v387_v30, %v384_v32 }
 0x4fb   :  { %390 = vst.msk [vmem:[#allocation4] sm:$0xf] %vm389_vm6, %v388_v33 }
 0x4fc   :  { %412 = dma.vmem_to_hbm [thread:$0]  %s408_s28, 64, %s410_s30, [#allocation5]  }
 0x4fe   :  { %v385_v34 = vpop.f32.mrf.mxu1 }
 0x4ff   :  { %549 = dma.done.wait [#allocation3], 64  }
 0x500   :  { %550 = vsyncadd [#allocation3], 4294967232 }
 0x501   :  { %551 = dma.done.wait [#allocation5], 64  }
 0x502   :  { %552 = vsyncadd [#allocation5], 4294967232 }
 0x503   :  { %421 = vsyncpa [#allocation3], 1 }
 0x504   :  { %422 = vsyncpa [#allocation5], 1 }

</bundles_post_ra>
